<compile_context>
chip_gen: v7x
topology: tpu7x:2x2x1
jax: 0.10.0
libtpu: 0.0.40
codegen_flags: <defaults>
</compile_context>

<pallas_src>
import functools

import jax
import jax.numpy as jnp
from jax import lax
from jax.experimental import pallas as pl
from jax.experimental.pallas import tpu as pltpu

_EPS = 1e-6  # F.pairwise_distance default eps (added to the raw difference)


def _contrastive_loss_kernel(o1_ref, o2_ref, label_ref, psum_ref, *,
                             margin, total_b, virtual_b, block_b,
                             blocks_per_chunk):
    c = pl.program_id(0)   # chunk (parallel axis)
    i = pl.program_id(1)   # batch block within the chunk (reduction axis)

    @pl.when(i == 0)
    def _init():
        psum_ref[...] = jnp.zeros_like(psum_ref)

    # Cast to f32 in-kernel; inputs are DMA'd in their native dtype.
    o1 = o1_ref[...].astype(jnp.float32)
    o2 = o2_ref[...].astype(jnp.float32)
    label = label_ref[...].astype(jnp.float32)                  # [TB, 1]

    diff = o1 - o2 + _EPS                                       # matches torch (x1 - x2 + eps)
    d2 = jnp.sum(diff * diff, axis=-1, keepdims=True)           # [TB, 1] squared distance
    dist = jnp.sqrt(d2)                                         # feeds only the hinge (EUP)
    hinge = jnp.maximum(margin - dist, 0.0)
    per = (1.0 - label) * d2 + label * (hinge * hinge)          # [TB, 1]

    if virtual_b != total_b:
        # Mask rows past the true batch size (boundary / clamped blocks).
        row = (c * blocks_per_chunk + i) * block_b + lax.broadcasted_iota(
            jnp.int32, per.shape, 0)
        per = jnp.where(row < total_b, per, 0.0)

    # Accumulate the chunk partial sum in the resident output block
    # (scalar broadcast across the 128-lane block; wrapper reads lane 0).
    psum_ref[...] += jnp.sum(per)


def _round_up(x, m):
    return (x + m - 1) // m * m


def _cdiv(a, b):
    return -(-a // b)


def _choose_block_b(d, itemsize):
    # Keep the double-buffered input working set (2 feature tiles + label column,
    # 2 pipeline buffers each) under ~20 MiB so it fits every generation's
    # scoped-VMEM budget (v5e/v6e 128 MiB, v7x 64 MiB) with headroom.
    budget = 20 * 1024 * 1024
    bytes_per_row = 2 * (2 * d + 1) * itemsize
    tb = budget // max(bytes_per_row, 1)
    tb = (min(tb, 2048) // 8) * 8
    return max(8, int(tb))


def contrastive_loss(output1, output2, label, margin=1.0, block_b=None):
    """output1, output2: [B, D]; label: [B]. Returns scalar mean contrastive loss."""
    B, D = output1.shape
    label2d = label.reshape(B, 1)
    itemsize = jnp.dtype(output1.dtype).itemsize

    # Two chunks (one per TensorCore on megacore parts) when the batch is big
    # enough to give each chunk at least one 8-row tile.
    num_chunks = 2 if B >= 16 else 1
    rpc = _cdiv(B, num_chunks)                       # rows per chunk

    if block_b is None:
        tb = _choose_block_b(D, itemsize)
        tb = min(tb, _round_up(rpc, 8))
        bpc = _cdiv(rpc, tb)
        tb = _round_up(_cdiv(rpc, bpc), 8)           # rebalance -> minimal tail padding
    else:
        tb = max(8, (int(block_b) // 8) * 8)
        tb = min(tb, _round_up(rpc, 8))
        bpc = _cdiv(rpc, tb)

    if num_chunks == 1 and bpc == 1:
        tb = B                                       # exact single block (== full dim is legal)

    last_blk = _cdiv(B, tb) - 1
    virtual_rows = num_chunks * bpc * tb

    kernel = functools.partial(
        _contrastive_loss_kernel,
        margin=float(margin), total_b=B, virtual_b=virtual_rows,
        block_b=tb, blocks_per_chunk=bpc)

    def in_map(c, i):
        # Clamp so no block window ever starts past the array (duplicated
        # clamped blocks are fully masked out inside the kernel).
        return (jnp.minimum(c * bpc + i, last_blk), 0)

    cost = pl.CostEstimate(
        flops=5 * B * D + 8 * B,
        transcendentals=B,
        bytes_accessed=2 * B * D * itemsize
        + B * jnp.dtype(label2d.dtype).itemsize + num_chunks * 512,
    )

    out = pl.pallas_call(
        kernel,
        out_shape=jax.ShapeDtypeStruct((num_chunks, 1, 128), jnp.float32),
        grid=(num_chunks, bpc),
        in_specs=[
            pl.BlockSpec((tb, D), in_map),
            pl.BlockSpec((tb, D), in_map),
            pl.BlockSpec((tb, 1), in_map),
        ],
        # Per-chunk accumulator: same block index across the reduction axis ->
        # stays resident in VMEM, written back to HBM once per chunk.
        out_specs=pl.BlockSpec((1, 1, 128), lambda c, i: (c, 0, 0)),
        compiler_params=pltpu.CompilerParams(
            dimension_semantics=("parallel", "arbitrary"),
            vmem_limit_bytes=32 * 1024 * 1024,
        ),
        cost_estimate=cost,
    )(output1, output2, label2d)

    # Tiny finalize in XLA: sum the per-chunk partials, divide by true batch.
    return jnp.sum(out[:, 0, 0]) / B


if __name__ == "__main__":
    key = jax.random.PRNGKey(0)
    k1, k2, k3 = jax.random.split(key, 3)

    def ref_loss(o1, o2, lab, margin=1.0):
        diff = o1 - o2 + _EPS
        dist = jnp.sqrt(jnp.sum(diff * diff, axis=-1))
        return jnp.mean((1.0 - lab) * dist ** 2
                        + lab * jnp.maximum(margin - dist, 0.0) ** 2)

    # Small shapes consistent with the module: embeddings [B, D], labels [B].
    B, D = 12, 32
    output1 = jax.random.normal(k1, (B, D), dtype=jnp.float32)
    output2 = jax.random.normal(k2, (B, D), dtype=jnp.float32)
    label = jax.random.bernoulli(k3, 0.5, (B,)).astype(jnp.float32)

    # Forced small tile: exercises multi-block accumulation + boundary masking.
    loss_tiled = contrastive_loss(output1, output2, label, block_b=8)
    # Auto tile: single exact block.
    loss_auto = contrastive_loss(output1, output2, label)
    jax.block_until_ready((loss_tiled, loss_auto))

    ref = ref_loss(output1, output2, label)
    assert jnp.allclose(loss_tiled, ref, rtol=1e-5, atol=1e-6), (loss_tiled, ref)
    assert jnp.allclose(loss_auto, ref, rtol=1e-5, atol=1e-6), (loss_auto, ref)

    # Larger batch: exercises the 2-chunk (megacore-ready) parallel axis.
    B2 = 24
    o1b = jax.random.normal(k1, (B2, D), dtype=jnp.float32)
    o2b = jax.random.normal(k2, (B2, D), dtype=jnp.float32)
    labb = jax.random.bernoulli(k3, 0.5, (B2,)).astype(jnp.float32)
    loss_2c = contrastive_loss(o1b, o2b, labb)
    jax.block_until_ready(loss_2c)
    assert jnp.allclose(loss_2c, ref_loss(o1b, o2b, labb), rtol=1e-5, atol=1e-6)

    print("KERNEL_OK")
</pallas_src>

<mosaic_0001>
module attributes {stable_mosaic.version = 11 : i64} {
  func.func @_contrastive_loss_kernel(%arg0: i32, %arg1: i32, %arg2: memref<8x32xf32, #tpu.memory_space<vmem>>, %arg3: memref<8x32xf32, #tpu.memory_space<vmem>>, %arg4: memref<8x1xf32, #tpu.memory_space<vmem>>, %arg5: memref<1x1x128xf32, #tpu.memory_space<vmem>>) attributes {dimension_semantics = [#tpu.dimension_semantics<parallel>, #tpu.dimension_semantics<arbitrary>], iteration_bounds = array<i64: 1, 2>, scalar_prefetch = 0 : i64, scratch_operands = 0 : i64, tpu.core_type = #tpu.core_type<tc>, window_params = [{transform_indices = @transform_0, window_bounds = array<i64: 8, 32>}, {transform_indices = @transform_1, window_bounds = array<i64: 8, 32>}, {transform_indices = @transform_2, window_bounds = array<i64: 8, 1>}, {transform_indices = @transform_3, window_bounds = array<i64: 1, 1, 128>}]} {
    %c0_i32 = arith.constant 0 : i32
    %0 = arith.cmpi eq, %arg1, %c0_i32 : i32
    %1 = arith.extui %0 : i1 to i32
    %c0_i32_0 = arith.constant 0 : i32
    %2 = arith.cmpi ne, %1, %c0_i32_0 : i32
    scf.if %2 {
      %cst_18 = arith.constant 0.000000e+00 : f32
      %41 = vector.broadcast %cst_18 : f32 to vector<1x1x128xf32>
      %c0_19 = arith.constant 0 : index
      %c0_20 = arith.constant 0 : index
      %c0_21 = arith.constant 0 : index
      %42 = vector.load %arg5[%c0_19, %c0_20, %c0_21] : memref<1x1x128xf32, #tpu.memory_space<vmem>>, vector<1x1x128xf32>
      tpu.vector_store %arg5[%c0_19, %c0_20, %c0_21], %41 {strides = array<i32>} : memref<1x1x128xf32, #tpu.memory_space<vmem>>, vector<1x1x128xf32>,
    } else {
    }
    %c0 = arith.constant 0 : index
    %c0_1 = arith.constant 0 : index
    %3 = vector.load %arg2[%c0, %c0_1] : memref<8x32xf32, #tpu.memory_space<vmem>>, vector<8x32xf32>
    %c0_2 = arith.constant 0 : index
    %c0_3 = arith.constant 0 : index
    %4 = vector.load %arg3[%c0_2, %c0_3] : memref<8x32xf32, #tpu.memory_space<vmem>>, vector<8x32xf32>
    %c0_4 = arith.constant 0 : index
    %c0_5 = arith.constant 0 : index
    %5 = vector.load %arg4[%c0_4, %c0_5] : memref<8x1xf32, #tpu.memory_space<vmem>>, vector<8x1xf32>
    %6 = arith.subf %3, %4 : vector<8x32xf32>
    %cst = arith.constant 9.99999997E-7 : f32
    %7 = vector.broadcast %cst : f32 to vector<8x32xf32>
    %8 = arith.addf %6, %7 : vector<8x32xf32>
    %9 = arith.mulf %8, %8 : vector<8x32xf32>
    %cst_6 = arith.constant dense<0.000000e+00> : vector<8xf32>
    %10 = vector.multi_reduction <add>, %9, %cst_6 [1] : vector<8x32xf32> to vector<8xf32>
    %11 = vector.shape_cast %10 : vector<8xf32> to vector<8x1xf32>
    %12 = math.sqrt %11 : vector<8x1xf32>
    %cst_7 = arith.constant 1.000000e+00 : f32
    %13 = vector.broadcast %cst_7 : f32 to vector<8x1xf32>
    %14 = arith.subf %13, %12 : vector<8x1xf32>
    %cst_8 = arith.constant 0.000000e+00 : f32
    %15 = vector.broadcast %cst_8 : f32 to vector<8x1xf32>
    %16 = arith.maximumf %14, %15 : vector<8x1xf32>
    %cst_9 = arith.constant 1.000000e+00 : f32
    %17 = vector.broadcast %cst_9 : f32 to vector<8x1xf32>
    %18 = arith.subf %17, %5 : vector<8x1xf32>
    %19 = arith.mulf %18, %11 : vector<8x1xf32>
    %20 = arith.mulf %16, %16 : vector<8x1xf32>
    %21 = arith.mulf %5, %20 : vector<8x1xf32>
    %22 = arith.addf %19, %21 : vector<8x1xf32>
    %c2_i32 = arith.constant 2 : i32
    %23 = arith.muli %arg0, %c2_i32 : i32
    %24 = arith.addi %23, %arg1 : i32
    %c8_i32 = arith.constant 8 : i32
    %25 = arith.muli %24, %c8_i32 : i32
    %26 = tpu.iota {dimensions = array<i32: 0>} : vector<8x1xi32>
    %27 = vector.broadcast %25 : i32 to vector<8x1xi32>
    %28 = arith.addi %27, %26 : vector<8x1xi32>
    %c12_i32 = arith.constant 12 : i32
    %29 = vector.broadcast %c12_i32 : i32 to vector<8x1xi32>
    %30 = arith.cmpi slt, %28, %29 : vector<8x1xi32>
    %cst_10 = arith.constant 0.000000e+00 : f32
    %31 = vector.broadcast %cst_10 : f32 to vector<8x1xf32>
    %32 = arith.select %30, %22, %31 : vector<8x1xi1>, vector<8x1xf32>
    %c0_11 = arith.constant 0 : index
    %c0_12 = arith.constant 0 : index
    %c0_13 = arith.constant 0 : index
    %33 = vector.load %arg5[%c0_11, %c0_12, %c0_13] : memref<1x1x128xf32, #tpu.memory_space<vmem>>, vector<1x1x128xf32>
    %34 = vector.shape_cast %32 : vector<8x1xf32> to vector<1x8x1xf32>
    %cst_14 = arith.constant dense<0.000000e+00> : vector<1xf32>
    %35 = vector.multi_reduction <add>, %34, %cst_14 [1, 2] : vector<1x8x1xf32> to vector<1xf32>
    %36 = vector.shape_cast %35 : vector<1xf32> to vector<1x1x1xf32>
    %37 = vector.extract %36[0, 0, 0] : f32 from vector<1x1x1xf32>
    %38 = vector.broadcast %37 : f32 to vector<1x1x128xf32>
    %39 = arith.addf %33, %38 : vector<1x1x128xf32>
    %c0_15 = arith.constant 0 : index
    %c0_16 = arith.constant 0 : index
    %c0_17 = arith.constant 0 : index
    %40 = vector.load %arg5[%c0_15, %c0_16, %c0_17] : memref<1x1x128xf32, #tpu.memory_space<vmem>>, vector<1x1x128xf32>
    tpu.vector_store %arg5[%c0_15, %c0_16, %c0_17], %39 {strides = array<i32>} : memref<1x1x128xf32, #tpu.memory_space<vmem>>, vector<1x1x128xf32>,
    return
  }
  func.func @transform_0(%arg0: i32, %arg1: i32) -> (i32, i32) {
    %c2_i32 = arith.constant 2 : i32
    %0 = arith.muli %arg0, %c2_i32 : i32
    %1 = arith.addi %0, %arg1 : i32
    %c1_i32 = arith.constant 1 : i32
    %2 = arith.minsi %1, %c1_i32 : i32
    %c0_i32 = arith.constant 0 : i32
    %c0_i32_0 = arith.constant 0 : i32
    return %2, %c0_i32 : i32, i32
  }
  func.func @transform_1(%arg0: i32, %arg1: i32) -> (i32, i32) {
    %c2_i32 = arith.constant 2 : i32
    %0 = arith.muli %arg0, %c2_i32 : i32
    %1 = arith.addi %0, %arg1 : i32
    %c1_i32 = arith.constant 1 : i32
    %2 = arith.minsi %1, %c1_i32 : i32
    %c0_i32 = arith.constant 0 : i32
    %c0_i32_0 = arith.constant 0 : i32
    return %2, %c0_i32 : i32, i32
  }
  func.func @transform_2(%arg0: i32, %arg1: i32) -> (i32, i32) {
    %c2_i32 = arith.constant 2 : i32
    %0 = arith.muli %arg0, %c2_i32 : i32
    %1 = arith.addi %0, %arg1 : i32
    %c1_i32 = arith.constant 1 : i32
    %2 = arith.minsi %1, %c1_i32 : i32
    %c0_i32 = arith.constant 0 : i32
    %c0_i32_0 = arith.constant 0 : i32
    return %2, %c0_i32 : i32, i32
  }
  func.func @transform_3(%arg0: i32, %arg1: i32) -> (i32, i32, i32) {
    %c0_i32 = arith.constant 0 : i32
    %c0_i32_0 = arith.constant 0 : i32
    %c0_i32_1 = arith.constant 0 : i32
    return %arg0, %c0_i32, %c0_i32_0 : i32, i32, i32
  }
}

</mosaic_0001>

<bundles_post_ra>
// kernel: tpu_custom_call.1
= control target key start
LH: loop header
LB: loop body
LE: loop exit
PB: predicated region body
PF: predicated region fallthrough
CT: control target
= control target key end

     0   :  { %8 = vsyncpa [#allocation3], 0  ;;  %s822_s0 = inlined_call_operand.vmem [shape: f32[12,32], index: 0, kind: input, shape index: {}]   ;;  %s823_s1 = inlined_call_operand.hbm [shape: f32[12,32], index: 1, kind: input, shape index: {}]   ;;  %s824_s2 = inlined_call_operand.vmem [shape: f32[12,1], index: 2, kind: input, shape index: {}]   ;;  %s825_s3 = inlined_call_operand.hbm [shape: f32[1,1,128], index: 3, kind: output, shape index: {}]  }
   0x1   :  { %10 = vsyncpa [#allocation3 + $0x1], 0 }
   0x2   :  { %11 = vsyncpa [#allocation4], 0  ;;  %s667_s12 = smov 0   ;;  %s669_s13 = smov 0  }
   0x3   :  { %s671_s14 = smov 0   ;;  %s673_s15 = smov 0  }
   0x4   :  { %s675_s16 = smov 0   ;;  %s677_s17 = smov 0  }
   0x5 LB: > { %s444_s18 = sadd.s32 4294967295, %s642_s17   ;;  %s26_s19 = sadd.s32 1, %s638_s16  ;;  %s642_s17 = sphi %s677_s17, %s17_s17   ;;  %s638_s16 = sphi %s675_s16, %s835_s16   ;;  %s634_s15 = sphi %s673_s15, %s834_s15   ;;  %s630_s14 = sphi %s671_s14, %s833_s14   ;;  %s626_s13 = sphi %s669_s13, %s832_s13   ;;  %s622_s12 = sphi %s667_s12, %s831_s12  }
   0x6   : > { %p27_p0 = scmp.ge.s32.totalorder %s26_s19, 2  ;;  %p69_p1 = scmp.lt.s32.totalorder %s638_s16, 1 }
   0x7   : > { %s78_s20 = sadd.s32 1, %s630_s14  ;;  %p85_p2 = scmp.ne.s32.totalorder %s630_s14, %s626_s13 }
   0x8   : > { %s837_s19 = smov (%p27_p0, %s26_s19), 0  ;;  %p86_p4 = scmp.eq.s32.totalorder %s642_s17, 0 }
   0x9   : > { %s70_s21 = scalar_select %p69_p1, %s638_s16, 1 }
   0xa   : > { %p73_p3 = scmp.lt.s32.totalorder %s837_s19, 1  ;;  %p91_p5 = scmp.ne.s32.totalorder %s626_s13, %s622_s12 }
   0xb   : > { %p92_p6 = scmp.eq.s32.totalorder %s444_s18, 0  ;;  %p87_p7 = por %p86_p4, %p85_p2 }
   0xc   : > { %s74_s22 = scalar_select %p73_p3, %s837_s19, 1 }
   0xd   : > { %p710_p8 = por %p92_p6, %p91_p5  ;;  %p477_p10 = scmp.lt.s32.totalorder %s642_s17, 2 }
   0xe   : > { %s75_s24 = ssub.s32 %s70_s21, %s74_s22  ;;  %s190_s25 = sand.u32 1, %s630_s14  }
   0xf   : > { %p76_p9 = scmp.eq.s32.totalorder %s75_s24, 0  ;;  %s448_s26 = sshll.u32 %s70_s21, 7 }
  0x10   : > { %s447_s28 = sshll.u32 %s190_s25, 3  ;;  %s722_s4 = scalar_lea.hbm %s823_s1, %s448_s26 }
  0x11   : > { %s717_s27 = scalar_select %p76_p9, %s630_s14, %s78_s20  }
  0x12   : > { %s194_s5 = scalar_lea.vmem [#allocation2], %s447_s28  ;;  %p724_p11 = pnand %p477_p10, %p87_p7 }
  0x13   : > { %s205_s6 = sshll.u32 %s194_s5, 4  ;;  %s191_s8 = scalar_lea.sflag [#allocation3], %s190_s25  ;;  %s728_s6 = int_to_ptr.vmem [resolvable:$true] %s205_s6 }
  0x14   : > { %s532_s9 = scalar_lea.hbm %s722_s4, 128  ;;  %p534_p1 = pneg %p724_p11 }
  0x15   : > { %p533_p0 = scmp.ne.s32.totalorder %s722_s4, %s532_s9  ;;  %s537_s12 = scalar_lea.hbm %s823_s1, 256 }
  0x16   : > { %p538_p4 = scmp.lt.u32.totalorder %s722_s4, %s823_s1  ;;  %p539_p5 = scmp.lt.u32.totalorder %s537_s12, %s532_s9 }
  0x17   : > { %p535_p2 = pnand %p534_p1, %p533_p0  ;;  %p541_p7 = scmp.lt.u32.totalorder %s532_s9, %s722_s4 }
  0x18   : > { %p540_p6 = por %p539_p5, %p538_p4 }
  0x19   : > { %p536_p3 = pneg %p535_p2 }
  0x1a   : > { %p542_p9 = por %p541_p7, %p540_p6 }
  0x1c   : > { %p543_p10 = pnand %p542_p9, %p536_p3 }
  0x1e   : > { %546 = shalt.err (!%p543_p10)
}
  0x1f   : > { %s547_s22 = scalar_lea.vmem %s728_s6, 128  ;;  %s644_s24 = smov [#allocation2]  }
  0x20   : > { %p548_p0 = scmp.ne.s32.totalorder %s728_s6, %s547_s22  ;;  %s552_s25 = sshll.u32 %s644_s24, 4  ;;  %s553_s25 = int_to_ptr.vmem [resolvable:$false] %s552_s25 }
  0x21   : > { %s554_s26 = scalar_lea.vmem %s553_s25, 256  ;;  %p555_p13 = scmp.lt.s32.totalorder %s728_s6, %s553_s25 }
  0x22   : > { %p550_p2 = pnand %p548_p0, %p534_p1  ;;  %p556_p4 = scmp.lt.s32.totalorder %s554_s26, %s547_s22 }
  0x24   : > { %p551_p12 = pneg %p550_p2  ;;  %p557_p5 = por %p556_p4, %p555_p13 }
  0x26   : > { %p558_p6 = pnand %p557_p5, %p551_p12 }
  0x28   : > { %561 = shalt.err (!%p558_p6)
}
  0x29   : > { %476 = dma.hbm_to_vmem [thread:$0]  (!%p724_p11), %s722_s4, 128, %s728_s6, %s191_s8  }
  0x2a   : > { %p828_p3 = scmp.lt.s32.totalorder %s642_s17, 3  ;;  %p829_p7 = scmp.ge.s32.totalorder %s642_s17, 1 }
  0x2c   : > { %p226_p1 = pnand %p829_p7, %p828_p3 }
  0x2d   : > { %s231_s28 = sand.u32 (!%p226_p1), 1, %s626_s13  }
  0x2e   : > { %229 = sbr.rel (%p226_p1) target bundleno = 464 (0x1d0), region = 32  ;;  %s450_s29 = sshll.u32 (!%p226_p1), %s231_s28, 3 }
  0x2f   : > { %s232_s30 = scalar_lea.sflag (!%p226_p1), [#allocation3], %s231_s28  ;;  %s235_s5 = scalar_lea.vmem (!%p226_p1), [#allocation2], %s450_s29 }
  0x35   : > { %613 = dma.done.wait (%p710_p8), %s232_s30, 128  }
  0x36   : > { %615 = vsyncadd (%p710_p8), %s232_s30, 4294967168  ;;  %p271_p12 = scmp.lt.s32.totalorder %s634_s15, 1  ;;  %p459_p11 = scmp.ne.s32.totalorder %s634_s15, 0 }
  0x37   : > { %v645_v0 = vmov (!%p459_p11), 0.0  }
  0x38   : > { %s272_s7 = scalar_select %p271_p12, %s634_s15, 1 }
  0x39   : > { %300 = sbr.rel (%p459_p11) target bundleno = 64 (0x40), region = 40  ;;  %301 = vst [vmem:[#allocation5] sm:$0x1] (!%p459_p11), %v645_v0 }
  0x3a   : > { %s839_s7 = smov (!%p271_p12, %s272_s7), 1 }
  0x3b   : > { %s454_s4 = sshll.u32 %s839_s7, 3 }
  0x3c   : > { %s276_s9 = scalar_lea.vmem %s822_s0, %s454_s4  ;;  %s292_s12 = scalar_lea.vmem %s824_s2, %s454_s4 }
  0x40 PF: > { %v302_v1 = vld [vmem:[%s276_s9] sm:$0xff]  ;;  %vm308_vm0 = vcmask 261120   ;;  %v329_v9 = vlaneseq  ;;  %s460_s23 = sshll.u32 %s634_s15, 3  ;;  %vm336_vm4 = vcmask 7168   ;;  %v335_v34 = vld [vmem:[#allocation5] sm:$0x1] }
  0x41   : > { %v303_v2 = vld [vmem:[%s235_s5] sm:$0xff]  ;;  %v331_v17 = vstv %s460_s23  ;;  %s646_s15 = smov [#allocation5]   ;;  %p778_p8 = scmp.eq.s32.totalorder %s444_s18, 1 }
  0x42   : > { %v305_v3 = vsub.f32 %v302_v1, %v303_v2  ;;  %v304_v13 = vld [vmem:[%s292_s12] sm:$0xff]  ;;  %v330_v15 = vshrl.u32 %v329_v9, 7  ;;  %s359_s20 = sshll.u32 %s646_s15, 4  ;;  %s360_s20 = int_to_ptr.vmem [resolvable:$true] %s359_s20 }
  0x43   : > { %v321_v19 = vsub.f32 1.0, %v304_v13  ;;  %s562_s24 = scalar_lea.vmem %s360_s20, 16  ;;  %s568_s25 = scalar_lea.vmem %s360_s20, 32 }
  0x44   : > { %v306_v4 = vadd.f32 1e-06, %v305_v3  ;;  %v332_v20 = vadd.s32 %v331_v17, %v330_v15  ;;  %p563_p13 = scmp.ne.s32.totalorder %s360_s20, %s562_s24  ;;  %p569_p0 = scmp.lt.s32.totalorder %s360_s20, %s360_s20 }
  0x45   : > { %p570_p2 = scmp.lt.s32.totalorder %s568_s25, %s562_s24 }
  0x46   : > { %v307_v5 = vmul.f32 %v306_v4, %v306_v4  ;;  %vm333_vm3 = vcmp.lt.s32.totalorder %v332_v20, 12  ;;  %p564_p9 = pnand %p563_p13, %p778_p8 }
  0x47   : > { %p571_p4 = por %p570_p2, %p569_p0 }
  0x48   : > { %v309_v6 = vsel %vm308_vm0, %v307_v5, 0.0  ;;  %p565_p10 = pneg %p564_p9 }
  0x49   : > { %310 = vadd.xlane.f32.xlu0 %v309_v6 }
  0x4a   : > { %p572_p5 = pnand %p571_p4, %p565_p10 }
  0xd6   : > { %v311_v7 = vpop.xlane.xlu0 %310 }
  0xd7   : > { %530 = vrsqrt.f32 %v311_v7  ;;  %vm314_vm1 = vcmp.eq.f32.partialorder %v311_v7, inf  ;;  %v317_v11 = vand.u32 2147483648, %v311_v7  ;;  %vm316_vm2 = vcmp.eq.f32.partialorder %v311_v7, 0.0 }
  0xd8   : > { %v322_v22 = vmul.f32 %v321_v19, %v311_v7 }
  0xe1   : > { %v531_v8 = vpop.eup %530 }
  0xe2   : > { %v313_v10 = vmul.f32 %v531_v8, %v311_v7 }
  0xe4   : > { %v315_v12 = vsel %vm314_vm1, %v311_v7, %v313_v10 }
  0xe5   : > { %v318_v14 = vsel %vm316_vm2, %v317_v11, %v315_v12 }
  0xe6   : > { %v319_v16 = vsub.f32 1.0, %v318_v14 }
  0xe8   : > { %v320_v18 = vmax.f32 %v319_v16, 0.0 }
  0xea   : > { %v323_v21 = vmul.f32 %v320_v18, %v320_v18 }
  0xec   : > { %v324_v23 = vmul.f32 %v323_v21, %v304_v13 }
  0xee   : > { %v325_v24 = vadd.f32 %v324_v23, %v322_v22 }
  0xf0   : > { %v334_v25 = vsel %vm333_vm3, %v325_v24, 0.0 }
  0xf1   : > { %v337_v26 = vsel %vm336_vm4, %v334_v25, 0.0 }
  0xf2   : > { %338 = vadd.xlane.f32.xlu0 %v337_v26 }
 0x17f   : > { %v339_v27 = vpop.xlane.xlu0 %338 }
 0x180   : > { %v340_v28 = vrot.slane %v339_v27, 4 }
 0x182   : > { %v341_v29 = vadd.f32 %v340_v28, %v339_v27 }
 0x184   : > { %v342_v30 = vrot.slane %v341_v29, 2 }
 0x186   : > { %v343_v31 = vadd.f32 %v342_v30, %v341_v29 }
 0x188   : > { %v344_v32 = vrot.slane %v343_v31, 1 }
 0x18a   : > { %v345_v33 = vadd.f32 %v344_v32, %v343_v31 }
 0x18c   : > { %465 = vpush %v345_v33 }
 0x1bd   : > { %s466_s21 = spop %465 }
 0x1be   : > { %v347_v35 = vstv %s466_s21 }
 0x1bf   : > { %v348_v36 = vadd.f32 %v347_v35, %v335_v34 }
 0x1c1   : > { %349 = vst [vmem:[#allocation5] sm:$0x1] %v348_v36 }
 0x1c2   : > { %575 = shalt.err (!%p572_p5)
}
 0x1c3   : > { %s576_s28 = scalar_lea.hbm %s825_s3, 16 }
 0x1c4   : > { %p577_p6 = scmp.ne.s32.totalorder %s825_s3, %s576_s28  ;;  %p582_p1 = scmp.lt.u32.totalorder %s576_s28, %s825_s3 }
 0x1c6   : > { %p578_p3 = pnand %p577_p6, %p778_p8 }
 0x1c8   : > { %p579_p7 = pneg %p578_p3 }
 0x1ca   : > { %p584_p12 = pnand %p582_p1, %p579_p7 }
 0x1cc   : > { %587 = shalt.err (!%p584_p12)
}
 0x1cd   : > { %470 = dma.vmem_to_hbm [thread:$0]  (%p778_p8), %s360_s20, 16, %s825_s3, [#allocation4]  }
 0x1ce   : > { %617 = dma.done.wait (%p778_p8), [#allocation4], 16  }
 0x1cf   : > { %619 = vsyncadd (%p778_p8), [#allocation4], 4294967280 }
 0x1d0 PF: > { %s17_s17 = sadd.s32 1, %s642_s17   ;;  %s831_s12 = smov %s626_s13 }
 0x1d1   : > { %p14_p11 = scmp.ge.s32.totalorder %s17_s17, 4   ;;  %s832_s13 = smov %s630_s14 }
 0x1d2   : > { %s833_s14 = smov %s717_s27  ;;  %s834_s15 = smov %s638_s16 }
 0x1d3   : > { %s835_s16 = smov %s837_s19  ;;  %16 = sbr.rel (!%p14_p11) target bundleno = 5 (0x5), region = 80 }
 0x1da   :  { %372 = vsyncpa [#allocation3], 1 }
 0x1db   :  { %374 = vsyncpa [#allocation3 + $0x1], 1 }
 0x1dc   :  { %375 = vsyncpa [#allocation4], 1 }
 0x1dd   :  { %377 = vsyncpa [#allocation4 + $0x1], 1 }

</bundles_post_ra>
